<compile_context>
chip_gen: v5e
topology: v5e:2x2
jax: 0.10.0
libtpu: 0.0.40
codegen_flags: <defaults>
</compile_context>

<pallas_src>
import functools

import jax
import jax.numpy as jnp
from jax import lax
from jax.experimental import pallas as pl
from jax.experimental.pallas import tpu as pltpu


def _logit_adjust_ce_kernel(x_ref, m_ref, picked_ref, out_ref, *, n_total, tile_n):
    """One batch-tile of logit-adjusted cross entropy.

    x_ref:      (TN, C)     logits tile (f32 or bf16; upcast to f32 here)
    m_ref:      (1, C)      f32 logit adjustment = tau * log(class prior)
    picked_ref: (TN, 1)     f32 x[i, target[i]] + m[target[i]] (gathered in wrapper)
    out_ref:    (1, 8, 128) f32 partial sum of per-sample NLL for this tile,
                broadcast over the slab (lane-dense, unmasked store).
    """
    i = pl.program_id(0)

    x = x_ref[...].astype(jnp.float32)   # in-kernel upcast (halves HBM bytes for bf16)
    xm = x + m_ref[...]                  # (TN, C) f32

    # Numerically stable log-sum-exp.  exp() lands on the EUP slot, the two lane
    # reductions on the XLU slot; both hide under the HBM DMA of the next tile.
    mmax = jnp.max(xm, axis=-1, keepdims=True)                                # (TN, 1)
    lse = mmax + jnp.log(jnp.sum(jnp.exp(xm - mmax), axis=-1, keepdims=True))  # (TN, 1)

    per_sample = lse - picked_ref[...]                                        # (TN, 1)

    # Drop padded tail rows (last tile may extend past N).  Must stay a select so
    # that -inf / NaN in the out-of-bounds rows is discarded, never multiplied.
    row_ids = i * tile_n + lax.broadcasted_iota(jnp.int32, per_sample.shape, 0)
    per_sample = jnp.where(row_ids < n_total, per_sample, 0.0)

    out_ref[...] = jnp.broadcast_to(jnp.sum(per_sample), out_ref.shape)


def _choose_tile_n(n, c, itemsize):
    """~4 MiB of logits per tile, rounded to the dtype's sublane packing, while
    keeping at least 2 tiles so the "parallel" grid axis can shard across both
    TensorCores on v7x (harmless on single-TC v5e/v6e)."""
    target_bytes = 4 * 1024 * 1024
    sub = 8 * max(1, 4 // max(1, itemsize))      # 8 rows f32, 16 bf16, 32 i8/fp8
    tn = (target_bytes // max(1, c * itemsize)) // sub * sub
    tn = max(sub, tn)
    if n > sub:
        # cap at ~half the batch (rounded up to the sublane pack) -> >= 2 tiles
        half = ((n + 1) // 2 + sub - 1) // sub * sub
        tn = min(tn, half)
    if tn >= n:
        # single tile: block dim must be a multiple of `sub` or equal the full dim
        tn = n if (n < sub or n % sub == 0) else (n // sub) * sub
    return max(1, tn)


def logit_adjust_loss(x, target, cls_num_list, tau=1.0, weight=None, tile_n=None):
    """JAX/Pallas equivalent of LogitAdjust.forward (mean-reduced cross entropy)."""
    if weight is not None:
        # TODO(synk): per-class weighting of cross_entropy not implemented.
        raise NotImplementedError("weight is not supported")

    cls_num = jnp.asarray(cls_num_list, dtype=jnp.float32)
    cls_p = cls_num / jnp.sum(cls_num)
    # NOTE: log(0) -> -inf for zero-count classes (same as the PyTorch module).
    m_flat = (tau * jnp.log(cls_p)).astype(jnp.float32)          # (C,)
    m_list = m_flat.reshape(1, -1)                               # (1, C)

    n, c = x.shape
    tgt = target.astype(jnp.int32).reshape(n)

    # Target-logit gather done once in the wrapper (~4N extra HBM bytes) so the
    # kernel hot loop carries no one-hot / iota / select work per element.
    picked = (jnp.take_along_axis(x, tgt[:, None], axis=-1).astype(jnp.float32)
              + m_flat[tgt][:, None])                            # (N, 1) f32

    if tile_n is None:
        tile_n = _choose_tile_n(n, c, jnp.dtype(x.dtype).itemsize)
    num_tiles = pl.cdiv(n, tile_n)

    kernel = functools.partial(_logit_adjust_ce_kernel, n_total=n, tile_n=tile_n)

    partials = pl.pallas_call(
        kernel,
        out_shape=jax.ShapeDtypeStruct((num_tiles, 8, 128), jnp.float32),
        grid=(num_tiles,),
        in_specs=[
            pl.BlockSpec((tile_n, c), lambda i: (i, 0)),   # logits tile, pipelined
            pl.BlockSpec((1, c), lambda i: (0, 0)),        # m_list, grid-invariant
            pl.BlockSpec((tile_n, 1), lambda i: (i, 0)),   # gathered target logit
        ],
        out_specs=pl.BlockSpec((1, 8, 128), lambda i: (i, 0, 0)),
        compiler_params=pltpu.CompilerParams(
            dimension_semantics=("parallel",),             # shard tiles across TCs on v7x
            vmem_limit_bytes=48 * 1024 * 1024,             # headroom under v7x's 64 MiB
        ),
    )(x, m_list, picked)

    # TODO(synk): for vocab-scale C (32k+ classes) add a second "arbitrary" grid
    # axis over C with an online (flash-style) logsumexp accumulator so the
    # (tile_n, C) block no longer has to fit VMEM in one piece.

    # Final mean over the true batch size: a handful of floats, done in plain JAX.
    return jnp.sum(partials[:, 0, 0]) / jnp.float32(n)


def _reference(x, target, cls_num_list, tau=1.0):
    cls_num = jnp.asarray(cls_num_list, dtype=jnp.float32)
    cls_p = cls_num / jnp.sum(cls_num)
    m_list = (tau * jnp.log(cls_p)).reshape(1, -1)
    xm = x.astype(jnp.float32) + m_list
    logp = xm - jax.scipy.special.logsumexp(xm, axis=-1, keepdims=True)
    nll = -jnp.take_along_axis(logp, target.reshape(-1, 1).astype(jnp.int32), axis=-1)
    return jnp.mean(nll)


if __name__ == "__main__":
    # NOTE: these shapes (N=16, C=32) only exercise correctness; tile-size /
    # slot-saturation tuning must be done on production shapes.
    key = jax.random.PRNGKey(0)
    kx, kt = jax.random.split(key, 2)

    N, C = 16, 32  # small shapes: batch=16, num_classes=32
    x = jax.random.normal(kx, (N, C), dtype=jnp.float32)
    target = jax.random.randint(kt, (N,), 0, C, dtype=jnp.int32)
    # deterministic synthetic long-tailed class counts
    cls_num_list = jnp.asarray([1000.0 / (i + 1) for i in range(C)], jnp.float32)

    # 1) multi-tile path: tile_n=8 -> 2 tiles, "parallel" grid, partial-sum output
    loss = jax.block_until_ready(
        logit_adjust_loss(x, target, cls_num_list, tau=1.0, tile_n=8))
    ref = _reference(x, target, cls_num_list, tau=1.0)
    assert jnp.allclose(loss, ref, atol=1e-5, rtol=1e-5), (loss, ref)

    # 2) ragged batch (N not a multiple of tile_n) exercises tail-row masking
    N2 = 13
    loss2 = jax.block_until_ready(
        logit_adjust_loss(x[:N2], target[:N2], cls_num_list, tau=1.0, tile_n=8))
    ref2 = _reference(x[:N2], target[:N2], cls_num_list, tau=1.0)
    assert jnp.allclose(loss2, ref2, atol=1e-5, rtol=1e-5), (loss2, ref2)

    # 3) bf16 logits stream at half the HBM bytes; math stays in f32 inside the kernel
    xb = x.astype(jnp.bfloat16)
    loss3 = jax.block_until_ready(
        logit_adjust_loss(xb, target, cls_num_list, tau=1.0, tile_n=16))
    ref3 = _reference(xb.astype(jnp.float32), target, cls_num_list, tau=1.0)
    assert jnp.allclose(loss3, ref3, atol=1e-5, rtol=1e-5), (loss3, ref3)

    # 4) automatic tile selection (>= 2 tiles so v7x's two TCs both get work)
    loss4 = jax.block_until_ready(
        logit_adjust_loss(x, target, cls_num_list, tau=1.0, tile_n=None))
    assert jnp.allclose(loss4, ref, atol=1e-5, rtol=1e-5), (loss4, ref)

    print("KERNEL_OK")
</pallas_src>

<mosaic_0001>
module attributes {stable_mosaic.version = 11 : i64} {
  func.func @_logit_adjust_ce_kernel(%arg0: i32, %arg1: memref<8x32xf32, #tpu.memory_space<vmem>>, %arg2: memref<1x32xf32, #tpu.memory_space<vmem>>, %arg3: memref<8x1xf32, #tpu.memory_space<vmem>>, %arg4: memref<1x8x128xf32, #tpu.memory_space<vmem>>) attributes {dimension_semantics = [#tpu.dimension_semantics<parallel>], iteration_bounds = array<i64: 2>, scalar_prefetch = 0 : i64, scratch_operands = 0 : i64, tpu.core_type = #tpu.core_type<tc>, window_params = [{transform_indices = @transform_0, window_bounds = array<i64: 8, 32>}, {pipeline_mode = #tpu.pipeline_mode<synchronous>, transform_indices = @transform_1, window_bounds = array<i64: 1, 32>}, {transform_indices = @transform_2, window_bounds = array<i64: 8, 1>}, {transform_indices = @transform_3, window_bounds = array<i64: 1, 8, 128>}]} {
    %c0 = arith.constant 0 : index
    %c0_0 = arith.constant 0 : index
    %0 = vector.load %arg1[%c0, %c0_0] : memref<8x32xf32, #tpu.memory_space<vmem>>, vector<8x32xf32>
    %c0_1 = arith.constant 0 : index
    %c0_2 = arith.constant 0 : index
    %1 = vector.load %arg2[%c0_1, %c0_2] : memref<1x32xf32, #tpu.memory_space<vmem>>, vector<1x32xf32>
    %2 = vector.broadcast %1 : vector<1x32xf32> to vector<8x32xf32>
    %3 = arith.addf %0, %2 : vector<8x32xf32>
    %cst = arith.constant dense<0xFF800000> : vector<8xf32>
    %4 = vector.multi_reduction <maximumf>, %3, %cst [1] : vector<8x32xf32> to vector<8xf32>
    %5 = vector.shape_cast %4 : vector<8xf32> to vector<8x1xf32>
    %6 = vector.broadcast %5 : vector<8x1xf32> to vector<8x32xf32>
    %7 = arith.subf %3, %6 : vector<8x32xf32>
    %8 = math.exp %7 : vector<8x32xf32>
    %cst_3 = arith.constant dense<0.000000e+00> : vector<8xf32>
    %9 = vector.multi_reduction <add>, %8, %cst_3 [1] : vector<8x32xf32> to vector<8xf32>
    %10 = vector.shape_cast %9 : vector<8xf32> to vector<8x1xf32>
    %11 = math.log %10 : vector<8x1xf32>
    %12 = arith.addf %5, %11 : vector<8x1xf32>
    %c0_4 = arith.constant 0 : index
    %c0_5 = arith.constant 0 : index
    %13 = vector.load %arg3[%c0_4, %c0_5] : memref<8x1xf32, #tpu.memory_space<vmem>>, vector<8x1xf32>
    %14 = arith.subf %12, %13 : vector<8x1xf32>
    %c8_i32 = arith.constant 8 : i32
    %15 = arith.muli %arg0, %c8_i32 : i32
    %16 = tpu.iota {dimensions = array<i32: 0>} : vector<8x1xi32>
    %17 = vector.broadcast %15 : i32 to vector<8x1xi32>
    %18 = arith.addi %17, %16 : vector<8x1xi32>
    %c16_i32 = arith.constant 16 : i32
    %19 = vector.broadcast %c16_i32 : i32 to vector<8x1xi32>
    %20 = arith.cmpi slt, %18, %19 : vector<8x1xi32>
    %cst_6 = arith.constant 0.000000e+00 : f32
    %21 = vector.broadcast %cst_6 : f32 to vector<8x1xf32>
    %22 = arith.select %20, %14, %21 : vector<8x1xi1>, vector<8x1xf32>
    %23 = vector.shape_cast %22 : vector<8x1xf32> to vector<1x8x1xf32>
    %cst_7 = arith.constant dense<0.000000e+00> : vector<1xf32>
    %24 = vector.multi_reduction <add>, %23, %cst_7 [1, 2] : vector<1x8x1xf32> to vector<1xf32>
    %25 = vector.shape_cast %24 : vector<1xf32> to vector<1x1x1xf32>
    %26 = vector.extract %25[0, 0, 0] : f32 from vector<1x1x1xf32>
    %27 = vector.broadcast %26 : f32 to vector<1x8x128xf32>
    %c0_8 = arith.constant 0 : index
    %c0_9 = arith.constant 0 : index
    %c0_10 = arith.constant 0 : index
    %28 = vector.load %arg4[%c0_8, %c0_9, %c0_10] : memref<1x8x128xf32, #tpu.memory_space<vmem>>, vector<1x8x128xf32>
    tpu.vector_store %arg4[%c0_8, %c0_9, %c0_10], %27 {strides = array<i32>} : memref<1x8x128xf32, #tpu.memory_space<vmem>>, vector<1x8x128xf32>,
    return
  }
  func.func @transform_0(%arg0: i32) -> (i32, i32) {
    %c0_i32 = arith.constant 0 : i32
    %c0_i32_0 = arith.constant 0 : i32
    return %arg0, %c0_i32 : i32, i32
  }
  func.func @transform_1(%arg0: i32) -> (i32, i32) {
    %c0_i32 = arith.constant 0 : i32
    %c0_i32_0 = arith.constant 0 : i32
    %c0_i32_1 = arith.constant 0 : i32
    return %c0_i32, %c0_i32_0 : i32, i32
  }
  func.func @transform_2(%arg0: i32) -> (i32, i32) {
    %c0_i32 = arith.constant 0 : i32
    %c0_i32_0 = arith.constant 0 : i32
    return %arg0, %c0_i32 : i32, i32
  }
  func.func @transform_3(%arg0: i32) -> (i32, i32, i32) {
    %c0_i32 = arith.constant 0 : i32
    %c0_i32_0 = arith.constant 0 : i32
    %c0_i32_1 = arith.constant 0 : i32
    return %arg0, %c0_i32, %c0_i32_0 : i32, i32, i32
  }
}

</mosaic_0001>

<bundles_post_ra>
// kernel: tpu_custom_call.1
= control target key start
LH: loop header
LB: loop body
LE: loop exit
PB: predicated region body
PF: predicated region fallthrough
CT: control target
= control target key end

     0   :  { %8 = vsyncpa [#allocation3], 0  ;;  %s544_s0 = inlined_call_operand.vmem [shape: f32[16,32], index: 0, kind: input, shape index: {}]   ;;  %s545_s1 = inlined_call_operand.vmem [shape: f32[1,32], index: 1, kind: input, shape index: {}]   ;;  %s546_s2 = inlined_call_operand.vmem [shape: f32[16,1], index: 2, kind: input, shape index: {}]   ;;  %s547_s3 = inlined_call_operand.hbm [shape: f32[2,8,128], index: 3, kind: output, shape index: {}]  }
   0x1   :  { %10 = vsyncpa [#allocation3 + $0x1], 0  ;;  %s453_s12 = smov 0   ;;  %s455_s13 = smov 0  }
   0x2   :  { %s457_s14 = smov 0   ;;  %s459_s15 = smov 0  }
   0x3 LB: > { %s474_s16 = sadd.s32 4294967295, %s431_s15   ;;  %s311_s17 = sadd.s32 4294967294, %s431_s15   ;;  %s431_s15 = sphi %s459_s15, %s553_s15   ;;  %s427_s14 = sphi %s457_s14, %s552_s14   ;;  %s423_s13 = sphi %s455_s13, %s551_s13   ;;  %s419_s12 = sphi %s453_s12, %s550_s12  }
   0x4   : > { %s478_s18 = sadd.s32 1, %s431_s15   ;;  %s96_s19 = sadd.s32 1, %s427_s14 }
   0x5   : > { %s93_s20 = ssub.s32 %s431_s15, %s478_s18  ;;  %p106_p0 = scmp.ne.s32.totalorder %s427_s14, %s423_s13 }
   0x6   : > { %p94_p1 = scmp.eq.s32.totalorder %s93_s20, 0  ;;  %p107_p2 = scmp.eq.s32.totalorder %s474_s16, 1 }
   0x7   : > { %p112_p3 = scmp.ne.s32.totalorder %s423_s13, %s419_s12  ;;  %p113_p4 = scmp.eq.s32.totalorder %s311_s17, 1 }
   0x8   : > { %s489_s21 = scalar_select %p94_p1, %s427_s14, %s96_s19  }
   0x9   : > { %p491_p5 = por %p107_p2, %p106_p0  ;;  %p495_p6 = por %p113_p4, %p112_p3 }
   0xa   : > { %p314_p7 = scmp.ge.s32.totalorder %s431_s15, 1  ;;  %p148_p8 = scmp.lt.s32.totalorder %s431_s15, 3 }
   0xc   : > { %p149_p9 = pnand %p314_p7, %p148_p8 }
   0xd   : > { %p175_p10 = scmp.lt.s32.totalorder (!%p149_p9), %s474_s16, 1  ;;  %s318_s4 = sshll.u32 (!%p149_p9), %s474_s16, 3 }
   0xe   : > { %152 = sbr.rel (%p149_p9) target bundleno = 468 (0x1d4), region = 32  ;;  %s172_s8 = sand.u32 (!%p149_p9), 1, %s423_s13  }
   0xf   : > { %s315_s9 = sshll.u32 (!%p149_p9), %s172_s8, 3  ;;  %s225_s25 = scalar_lea.sflag (!%p149_p9), [#allocation3], %s172_s8 }
  0x10   : > { %s174_s17 = scalar_lea.vmem (!%p149_p9), [#allocation2], %s315_s9 }
  0x11   : > { %s237_s19 = sshll.u32 (!%p149_p9), %s174_s17, 4  ;;  %s238_s19 = int_to_ptr.vmem [resolvable:$true] %s237_s19 }
  0x13   : > { %s176_s24 = scalar_select %p175_p10, %s474_s16, 1  ;;  %v364_v0 = vld [vmem:[%s545_s1] ss:$0 sm:$0xff]  ;;  %vm189_vm0 = vcmask 261120   ;;  %v205_v9 = vlaneseq  ;;  %v207_v12 = vstv %s318_s4  ;;  %vm211_vm2 = vcmask 7168  }
  0x14   : > { %s235_s16 = scalar_lea.hbm %s547_s3, %s318_s4 }
  0x15   : > { %s316_s27 = sshll.u32 %s176_s24, 3  ;;  %v206_v11 = vshrl.u32 %v205_v9, 7  ;;  %s239_s20 = sshll.u32 %s235_s16, 4  ;;  %s240_s20 = int_to_ptr.hbm [resolvable:$true] %s239_s20 }
  0x16   : > { %s178_s30 = scalar_lea.vmem %s544_s0, %s316_s27  ;;  %s182_s7 = scalar_lea.vmem %s546_s2, %s316_s27 }
  0x17   : > { %v183_v1 = vld [vmem:[%s178_s30] sm:$0xff]  ;;  %v208_v14 = vadd.s32 %v207_v12, %v206_v11  ;;  %s383_s26 = sshra.s32 %s240_s20, 4  ;;  %s389_s30 = scalar_lea.hbm %s547_s3, 16  ;;  %s384_s26 = int_to_ptr.hbm [resolvable:$true] %s383_s26 }
  0x18   : > { %v188_v2 = vadd.f32 %v364_v0, %v183_v1  ;;  %v202_v16 = vld [vmem:[%s182_s7] sm:$0xff]  ;;  %s385_s27 = scalar_lea.hbm %s384_s26, 8  ;;  %p390_p0 = scmp.lt.s32.totalorder %s384_s26, %s547_s3 }
  0x19   : > { %vm209_vm1 = vcmp.lt.s32.totalorder %v208_v14, 16  ;;  %p386_p11 = scmp.ne.s32.totalorder %s384_s26, %s385_s27  ;;  %p391_p1 = scmp.lt.s32.totalorder %s389_s30, %s385_s27 }
  0x1a   : > { %v190_v3 = vsel %vm189_vm0, %v188_v2, -inf }
  0x1b   : > { %191 = vmax.xlane.f32.xlu0 %v190_v3  ;;  %p387_p12 = pnand %p386_p11, %p491_p5  ;;  %p392_p2 = por %p391_p1, %p390_p0 }
  0x1d   : > { %p388_p13 = pneg %p387_p12 }
  0x1f   : > { %p393_p3 = pnand %p392_p2, %p388_p13 }
  0x8e   : > { %v192_v4 = vpop.xlane.xlu0 %191 }
  0x8f   : > { %v193_v5 = vsub.f32 %v188_v2, %v192_v4 }
  0x91   : > { %v194_v6 = vmul.f32 1.442695, %v193_v5 }
  0x93   : > { %365 = vpow2.f32 %v194_v6 }
  0x99   : > { %v366_v7 = vpop.eup %365 }
  0x9a   : > { %v196_v8 = vsel %vm189_vm0, %v366_v7, 0.0 }
  0x9b   : > { %197 = vadd.xlane.f32.xlu0 %v196_v8 }
 0x10e   : > { %v198_v10 = vpop.xlane.xlu0 %197 }
 0x10f   : > { %367 = vlog2.f32 %v198_v10 }
 0x115   : > { %v368_v13 = vpop.eup %367 }
 0x116   : > { %v200_v15 = vmul.f32 0.6931472, %v368_v13 }
 0x118   : > { %v201_v17 = vadd.f32 %v200_v15, %v192_v4 }
 0x11a   : > { %v203_v18 = vsub.f32 %v201_v17, %v202_v16 }
 0x11c   : > { %v210_v19 = vsel %vm209_vm1, %v203_v18, 0.0 }
 0x11d   : > { %v212_v20 = vsel %vm211_vm2, %v210_v19, 0.0 }
 0x11e   : > { %213 = vadd.xlane.f32.xlu1 %v212_v20 }
 0x191   : > { %v214_v21 = vpop.xlane.xlu1 %213 }
 0x192   : > { %v215_v22 = vrot.slane %v214_v21, 4 }
 0x194   : > { %v216_v23 = vadd.f32 %v215_v22, %v214_v21 }
 0x196   : > { %v217_v24 = vrot.slane %v216_v23, 2 }
 0x198   : > { %v218_v25 = vadd.f32 %v217_v24, %v216_v23 }
 0x19a   : > { %v219_v26 = vrot.slane %v218_v25, 1 }
 0x19c   : > { %v220_v27 = vadd.f32 %v219_v26, %v218_v25 }
 0x19e   : > { %323 = vpush %v220_v27 }
 0x1cf   : > { %s324_s24 = spop %323 }
 0x1d0   : > { %v222_v28 = vstv %s324_s24 }
 0x1d1   : > { %223 = vst [vmem:[%s174_s17] sm:$0xff] %v222_v28 }
 0x1d2   : > { %396 = shalt.err (!%p393_p3)
}
 0x1d3   : > { %325 = dma.vmem_to_hbm [thread:$0]  (%p491_p5), %s238_s19, 128, %s240_s20, %s225_s25  }
 0x1d4 PF: > { %p331_p4 = scmp.ge.s32.totalorder %s431_s15, 2  ;;  %s251_s6 = sand.u32 1, %s419_s12  }
 0x1d5   : > { %s252_s7 = scalar_lea.sflag [#allocation3], %s251_s6 }
 0x1d6   : > { %p328_p7 = pnand %p331_p4, %p495_p6 }
 0x1d8   : > { %p329_p8 = pneg %p328_p7 }
 0x1da   : > { %414 = dma.done.wait (%p329_p8), %s252_s7, 128  }
 0x1db   : > { %416 = vsyncadd (%p329_p8), %s252_s7, 4294967168  ;;  %p13_p9 = scmp.ge.s32.totalorder %s478_s18, 4   ;;  %s550_s12 = smov %s423_s13 }
 0x1dc   : > { %s551_s13 = smov %s427_s14  ;;  %s552_s14 = smov %s489_s21 }
 0x1dd   : > { %s553_s15 = smov %s478_s18  ;;  %15 = sbr.rel (!%p13_p9) target bundleno = 3 (0x3), region = 70 }
 0x1e2   :  { %258 = vsyncpa [#allocation3], 1 }
 0x1e3   :  { %260 = vsyncpa [#allocation3 + $0x1], 1 }

</bundles_post_ra>
